<compile_context>
chip_gen: v7x
topology: tpu7x:2x2x1
jax: 0.10.0
libtpu: 0.0.40
codegen_flags: <defaults>
</compile_context>

<pallas_src>
import math

import jax
import jax.numpy as jnp
from jax import lax
from jax.experimental import pallas as pl
from jax.experimental.pallas import tpu as pltpu


def _encode_mean_std_kernel(
    x_ref,
    w_enc_ref, b_enc_ref,
    w_gb_ref, b_gb_ref,
    w_head_ref, b_head_ref,
    encb_ref, head_ref,
):
    dp = encb_ref.shape[-1]          # D * pack  (lane-dense activation width)
    x = x_ref[...]

    # enc_ = ReLU(x @ W_enc + b_enc)        (Dropout -> identity at inference)
    enc_ = jnp.dot(x, w_enc_ref[...], preferred_element_type=jnp.float32)
    enc_ = jnp.maximum(enc_ + b_enc_ref[...], 0.0)

    # Fused g/b branches: one (dp, 2*dp) matmul, then a lane-aligned split.
    gb = jnp.dot(enc_, w_gb_ref[...], preferred_element_type=jnp.float32)
    gb = jnp.maximum(gb + b_gb_ref[...], 0.0)
    enc_g = gb[:, :dp]
    enc_b = gb[:, dp:]

    # Fused mean/std head: output columns alternate (mean_pre, std_pre) for
    # each packed logical row.
    head = jnp.dot(enc_g, w_head_ref[...], preferred_element_type=jnp.float32)
    head = head + b_head_ref[...]
    # PyTorch Softplus(beta=1, threshold=20): x for x > 20, else log(1+exp(x)).
    softplus = jnp.where(head > 20.0, head, jnp.logaddexp(head, 0.0))
    col = lax.broadcasted_iota(jnp.int32, head.shape, 1)
    head_ref[...] = jnp.where(col % 2 == 1, softplus, head).astype(head_ref.dtype)

    encb_ref[...] = enc_b.astype(encb_ref.dtype)


def _round_up(v, m):
    return ((v + m - 1) // m) * m


def _block_diag(w, pack):
    """Block-diagonal replication of w (pack copies on the diagonal)."""
    if pack == 1:
        return w
    din, dout = w.shape
    out = jnp.zeros((din * pack, dout * pack), w.dtype)
    for j in range(pack):
        out = out.at[j * din:(j + 1) * din, j * dout:(j + 1) * dout].set(w)
    return out


def encode_mean_std_forward(x, params, *, tile_m=1024):
    """x: [..., D] float32. Returns (mean [...,1], std [...,1], enc_b [...,D])."""
    *lead, D = x.shape
    M = math.prod(lead)
    (w_enc, b_enc, w_g, b_g, w_b, b_b, w_mean, b_mean, w_std, b_std) = params

    # Pack `pack` logical rows into one lane-dense (128-wide) row when D < 128.
    pack = 128 // D if (D < 128 and 128 % D == 0) else 1
    dp = D * pack                    # lane width of packed activations
    quant = 8 * pack                 # tile granularity (keeps sublane dim % 8)

    # Large tiles amortize the ~0.35us/step overhead; keep >= 2 grid steps when
    # there is enough work so both v7x TensorCores stream concurrently.
    eff_tile = _round_up(min(tile_m, max(M, 1)), quant)
    grid_m = -(-M // eff_tile)
    if grid_m < 2 and M > quant:
        eff_tile = _round_up(-(-M // 2), quant)
        grid_m = -(-M // eff_tile)
    m_pad = grid_m * eff_tile
    rows = m_pad // pack             # packed rows in HBM
    tile_rows = eff_tile // pack     # packed rows per grid step (multiple of 8)

    # Pad + pack x: (M, D) -> (m_pad, D) -> (rows, dp); row-major, so free.
    x2 = x.reshape(M, D)
    if m_pad != M:
        x2 = jnp.pad(x2, ((0, m_pad - M), (0, 0)))
    xp = x2.reshape(rows, dp)

    # Lane-dense (block-diagonal) weights, built once in the wrapper.
    w_enc_p = _block_diag(w_enc, pack)                                  # (dp, dp)
    b_enc_p = jnp.tile(b_enc, (1, pack))                                # (1, dp)
    w_gb_p = jnp.concatenate(
        [_block_diag(w_g, pack), _block_diag(w_b, pack)], axis=1)       # (dp, 2*dp)
    b_gb_p = jnp.concatenate(
        [jnp.tile(b_g, (1, pack)), jnp.tile(b_b, (1, pack))], axis=1)   # (1, 2*dp)
    w_head_p = _block_diag(jnp.concatenate([w_mean, w_std], axis=1), pack)  # (dp, 2*pack)
    b_head_p = jnp.tile(jnp.concatenate([b_mean, b_std], axis=1), (1, pack))

    full = lambda a: pl.BlockSpec(a.shape, lambda i: (0,) * a.ndim)

    encb_p, head_p = pl.pallas_call(
        _encode_mean_std_kernel,
        out_shape=(
            jax.ShapeDtypeStruct((rows, dp), jnp.float32),        # packed enc_b
            jax.ShapeDtypeStruct((rows, 2 * pack), jnp.float32),  # packed (mean,std)
        ),
        grid_spec=pltpu.PrefetchScalarGridSpec(
            num_scalar_prefetch=0,
            grid=(grid_m,),
            in_specs=[
                pl.BlockSpec((tile_rows, dp), lambda i: (i, 0)),  # x tile
                full(w_enc_p), full(b_enc_p),
                full(w_gb_p), full(b_gb_p),
                full(w_head_p), full(b_head_p),
            ],
            out_specs=[
                pl.BlockSpec((tile_rows, dp), lambda i: (i, 0)),
                pl.BlockSpec((tile_rows, 2 * pack), lambda i: (i, 0)),
            ],
        ),
        compiler_params=pltpu.CompilerParams(
            dimension_semantics=("parallel",)),
    )(xp, w_enc_p, b_enc_p, w_gb_p, b_gb_p, w_head_p, b_head_p)

    # Unpack: row-major reshapes + padding slice-off (all wrapper-side, cheap).
    enc_b = encb_p.reshape(m_pad, D)[:M].reshape(*lead, D)
    head = head_p.reshape(m_pad, 2)[:M]
    mean = head[:, 0:1].reshape(*lead, 1)
    std = head[:, 1:2].reshape(*lead, 1)
    return mean, std, enc_b


def init_params(key, graph_node_dim):
    """Deterministic synthetic parameters (weights stored as [in, out])."""
    D = graph_node_dim
    ks = jax.random.split(key, 10)
    scale = 1.0 / jnp.sqrt(D)

    def w(k, shape):
        return jax.random.normal(k, shape, dtype=jnp.float32) * scale

    w_enc = w(ks[0], (D, D));  b_enc = w(ks[1], (1, D))
    w_g   = w(ks[2], (D, D));  b_g   = w(ks[3], (1, D))
    w_b   = w(ks[4], (D, D));  b_b   = w(ks[5], (1, D))
    w_mean = w(ks[6], (D, 1)); b_mean = w(ks[7], (1, 1))
    w_std  = w(ks[8], (D, 1)); b_std  = w(ks[9], (1, 1))
    return (w_enc, b_enc, w_g, b_g, w_b, b_b, w_mean, b_mean, w_std, b_std)


def reference_forward(x, params):
    """Pure-JAX reference of the PyTorch module (eval mode)."""
    (w_enc, b_enc, w_g, b_g, w_b, b_b, w_mean, b_mean, w_std, b_std) = params
    relu = lambda v: jnp.maximum(v, 0.0)
    enc_ = relu(x @ w_enc + b_enc[0])
    enc_g = relu(enc_ @ w_g + b_g[0])
    enc_b = relu(enc_ @ w_b + b_b[0])
    mean = enc_g @ w_mean + b_mean[0]
    pre = enc_g @ w_std + b_std[0]
    std = jnp.where(pre > 20.0, pre, jnp.logaddexp(pre, 0.0))
    return mean, std, enc_b


if __name__ == "__main__":
    # Small shapes consistent with the module: x has last dim = graph_node_dim.
    batch, seq, graph_node_dim = 2, 8, 32
    key = jax.random.PRNGKey(0)
    kx, kp = jax.random.split(key)

    x = jax.random.normal(kx, (batch, seq, graph_node_dim), dtype=jnp.float32)
    params = init_params(kp, graph_node_dim)

    # TODO(synk): nn.Dropout is stochastic only in training mode; inference
    # semantics (identity) are implemented here.

    mean, std, enc_b = jax.block_until_ready(
        encode_mean_std_forward(x, params, tile_m=1024))

    mean_r, std_r, enc_b_r = reference_forward(x, params)
    assert mean.shape == (batch, seq, 1)
    assert std.shape == (batch, seq, 1)
    assert enc_b.shape == (batch, seq, graph_node_dim)
    assert jnp.allclose(mean, mean_r, atol=1e-5, rtol=1e-5)
    assert jnp.allclose(std, std_r, atol=1e-5, rtol=1e-5)
    assert jnp.allclose(enc_b, enc_b_r, atol=1e-5, rtol=1e-5)
    assert bool(jnp.all(std > 0.0))

    print("KERNEL_OK")
</pallas_src>

<mosaic_0001>
module attributes {stable_mosaic.version = 11 : i64} {
  func.func @_encode_mean_std_kernel(%arg0: i32, %arg1: memref<8x128xf32, #tpu.memory_space<vmem>>, %arg2: memref<128x128xf32, #tpu.memory_space<vmem>>, %arg3: memref<1x128xf32, #tpu.memory_space<vmem>>, %arg4: memref<128x256xf32, #tpu.memory_space<vmem>>, %arg5: memref<1x256xf32, #tpu.memory_space<vmem>>, %arg6: memref<128x8xf32, #tpu.memory_space<vmem>>, %arg7: memref<1x8xf32, #tpu.memory_space<vmem>>, %arg8: memref<8x128xf32, #tpu.memory_space<vmem>>, %arg9: memref<8x8xf32, #tpu.memory_space<vmem>>) attributes {dimension_semantics = [#tpu.dimension_semantics<parallel>], iteration_bounds = array<i64: 1>, scalar_prefetch = 0 : i64, scratch_operands = 0 : i64, tpu.core_type = #tpu.core_type<tc>, window_params = [{transform_indices = @transform_0, window_bounds = array<i64: 8, 128>}, {pipeline_mode = #tpu.pipeline_mode<synchronous>, transform_indices = @transform_1, window_bounds = array<i64: 128, 128>}, {pipeline_mode = #tpu.pipeline_mode<synchronous>, transform_indices = @transform_2, window_bounds = array<i64: 1, 128>}, {pipeline_mode = #tpu.pipeline_mode<synchronous>, transform_indices = @transform_3, window_bounds = array<i64: 128, 256>}, {pipeline_mode = #tpu.pipeline_mode<synchronous>, transform_indices = @transform_4, window_bounds = array<i64: 1, 256>}, {pipeline_mode = #tpu.pipeline_mode<synchronous>, transform_indices = @transform_5, window_bounds = array<i64: 128, 8>}, {pipeline_mode = #tpu.pipeline_mode<synchronous>, transform_indices = @transform_6, window_bounds = array<i64: 1, 8>}, {transform_indices = @transform_7, window_bounds = array<i64: 8, 128>}, {transform_indices = @transform_8, window_bounds = array<i64: 8, 8>}]} {
    %c0 = arith.constant 0 : index
    %c0_0 = arith.constant 0 : index
    %0 = vector.load %arg1[%c0, %c0_0] : memref<8x128xf32, #tpu.memory_space<vmem>>, vector<8x128xf32>
    %c0_1 = arith.constant 0 : index
    %c0_2 = arith.constant 0 : index
    %1 = vector.load %arg2[%c0_1, %c0_2] : memref<128x128xf32, #tpu.memory_space<vmem>>, vector<128x128xf32>
    %cst = arith.constant dense<0.000000e+00> : vector<8x128xf32>
    %2 = tpu.matmul %0, %1, %cst {dimension_numbers = #tpu.dot_dimension_numbers<[1], [0], [0], [1], [0, 0, 1, 1], [], []>} : vector<8x128xf32>, vector<128x128xf32>, vector<8x128xf32> -> vector<8x128xf32>
    %c0_3 = arith.constant 0 : index
    %c0_4 = arith.constant 0 : index
    %3 = vector.load %arg3[%c0_3, %c0_4] : memref<1x128xf32, #tpu.memory_space<vmem>>, vector<1x128xf32>
    %4 = vector.broadcast %3 : vector<1x128xf32> to vector<8x128xf32>
    %5 = arith.addf %2, %4 : vector<8x128xf32>
    %cst_5 = arith.constant 0.000000e+00 : f32
    %6 = vector.broadcast %cst_5 : f32 to vector<8x128xf32>
    %7 = arith.maximumf %5, %6 : vector<8x128xf32>
    %c0_6 = arith.constant 0 : index
    %c0_7 = arith.constant 0 : index
    %8 = vector.load %arg4[%c0_6, %c0_7] : memref<128x256xf32, #tpu.memory_space<vmem>>, vector<128x256xf32>
    %cst_8 = arith.constant dense<0.000000e+00> : vector<8x256xf32>
    %9 = tpu.matmul %7, %8, %cst_8 {dimension_numbers = #tpu.dot_dimension_numbers<[1], [0], [0], [1], [0, 0, 1, 1], [], []>} : vector<8x128xf32>, vector<128x256xf32>, vector<8x256xf32> -> vector<8x256xf32>
    %c0_9 = arith.constant 0 : index
    %c0_10 = arith.constant 0 : index
    %10 = vector.load %arg5[%c0_9, %c0_10] : memref<1x256xf32, #tpu.memory_space<vmem>>, vector<1x256xf32>
    %11 = vector.broadcast %10 : vector<1x256xf32> to vector<8x256xf32>
    %12 = arith.addf %9, %11 : vector<8x256xf32>
    %cst_11 = arith.constant 0.000000e+00 : f32
    %13 = vector.broadcast %cst_11 : f32 to vector<8x256xf32>
    %14 = arith.maximumf %12, %13 : vector<8x256xf32>
    %15 = vector.extract_strided_slice %14 {offsets = [0, 0], sizes = [8, 128], strides = [1, 1]} : vector<8x256xf32> to vector<8x128xf32>
    %16 = vector.extract_strided_slice %14 {offsets = [0, 128], sizes = [8, 128], strides = [1, 1]} : vector<8x256xf32> to vector<8x128xf32>
    %c0_12 = arith.constant 0 : index
    %c0_13 = arith.constant 0 : index
    %17 = vector.load %arg6[%c0_12, %c0_13] : memref<128x8xf32, #tpu.memory_space<vmem>>, vector<128x8xf32>
    %cst_14 = arith.constant dense<0.000000e+00> : vector<8x8xf32>
    %18 = tpu.matmul %15, %17, %cst_14 {dimension_numbers = #tpu.dot_dimension_numbers<[1], [0], [0], [1], [0, 0, 1, 1], [], []>} : vector<8x128xf32>, vector<128x8xf32>, vector<8x8xf32> -> vector<8x8xf32>
    %c0_15 = arith.constant 0 : index
    %c0_16 = arith.constant 0 : index
    %19 = vector.load %arg7[%c0_15, %c0_16] : memref<1x8xf32, #tpu.memory_space<vmem>>, vector<1x8xf32>
    %20 = vector.broadcast %19 : vector<1x8xf32> to vector<8x8xf32>
    %21 = arith.addf %18, %20 : vector<8x8xf32>
    %cst_17 = arith.constant 2.000000e+01 : f32
    %22 = vector.broadcast %cst_17 : f32 to vector<8x8xf32>
    %23 = arith.cmpf ogt, %21, %22 : vector<8x8xf32>
    %cst_18 = arith.constant 0.000000e+00 : f32
    %24 = vector.broadcast %cst_18 : f32 to vector<8x8xf32>
    %25 = arith.maximumf %21, %24 : vector<8x8xf32>
    %26 = vector.broadcast %cst_18 : f32 to vector<8x8xf32>
    %27 = arith.subf %21, %26 : vector<8x8xf32>
    %28 = arith.cmpf one, %27, %27 : vector<8x8xf32>
    %29 = vector.broadcast %cst_18 : f32 to vector<8x8xf32>
    %30 = arith.addf %21, %29 : vector<8x8xf32>
    %31 = math.absf %27 : vector<8x8xf32>
    %cst_19 = arith.constant 0.000000e+00 : f32
    %32 = vector.broadcast %cst_19 : f32 to vector<8x8xf32>
    %33 = arith.subf %32, %31 : vector<8x8xf32>
    %34 = math.exp %33 : vector<8x8xf32>
    %35 = math.log1p %34 : vector<8x8xf32>
    %36 = arith.addf %25, %35 : vector<8x8xf32>
    %37 = arith.select %28, %30, %36 : vector<8x8xi1>, vector<8x8xf32>
    %38 = arith.select %23, %21, %37 : vector<8x8xi1>, vector<8x8xf32>
    %39 = tpu.iota {dimensions = array<i32: 1>} : vector<8x8xi32>
    %c2_i32 = arith.constant 2 : i32
    %c0_i32 = arith.constant 0 : i32
    %40 = arith.cmpi eq, %c2_i32, %c0_i32 : i32
    %c1_i32 = arith.constant 1 : i32
    %41 = arith.select %40, %c1_i32, %c2_i32 : i32
    %42 = vector.broadcast %41 : i32 to vector<8x8xi32>
    %43 = arith.remsi %39, %42 : vector<8x8xi32>
    %c0_i32_20 = arith.constant 0 : i32
    %44 = vector.broadcast %c0_i32_20 : i32 to vector<8x8xi32>
    %45 = arith.cmpi ne, %43, %44 : vector<8x8xi32>
    %c0_i32_21 = arith.constant 0 : i32
    %46 = vector.broadcast %c0_i32_21 : i32 to vector<8x8xi32>
    %47 = arith.cmpi slt, %43, %46 : vector<8x8xi32>
    %c0_i32_22 = arith.constant 0 : i32
    %48 = arith.cmpi slt, %41, %c0_i32_22 : i32
    %49 = vector.broadcast %48 : i1 to vector<8x8xi1>
    %50 = vector.broadcast %49 : vector<8x8xi1> to vector<8x8xi1>
    %51 = arith.xori %47, %50 : vector<8x8xi1>
    %52 = arith.andi %51, %45 : vector<8x8xi1>
    %53 = vector.broadcast %41 : i32 to vector<8x8xi32>
    %54 = arith.addi %43, %53 : vector<8x8xi32>
    %55 = arith.select %52, %54, %43 : vector<8x8xi1>, vector<8x8xi32>
    %c1_i32_23 = arith.constant 1 : i32
    %56 = vector.broadcast %c1_i32_23 : i32 to vector<8x8xi32>
    %57 = arith.cmpi eq, %55, %56 : vector<8x8xi32>
    %58 = arith.select %57, %38, %21 : vector<8x8xi1>, vector<8x8xf32>
    %c0_24 = arith.constant 0 : index
    %c0_25 = arith.constant 0 : index
    %59 = vector.load %arg9[%c0_24, %c0_25] : memref<8x8xf32, #tpu.memory_space<vmem>>, vector<8x8xf32>
    tpu.vector_store %arg9[%c0_24, %c0_25], %58 {strides = array<i32>} : memref<8x8xf32, #tpu.memory_space<vmem>>, vector<8x8xf32>,
    %c0_26 = arith.constant 0 : index
    %c0_27 = arith.constant 0 : index
    %60 = vector.load %arg8[%c0_26, %c0_27] : memref<8x128xf32, #tpu.memory_space<vmem>>, vector<8x128xf32>
    tpu.vector_store %arg8[%c0_26, %c0_27], %16 {strides = array<i32>} : memref<8x128xf32, #tpu.memory_space<vmem>>, vector<8x128xf32>,
    return
  }
  func.func @transform_0(%arg0: i32) -> (i32, i32) {
    %c0_i32 = arith.constant 0 : i32
    %c0_i32_0 = arith.constant 0 : i32
    return %arg0, %c0_i32 : i32, i32
  }
  func.func @transform_1(%arg0: i32) -> (i32, i32) {
    %c0_i32 = arith.constant 0 : i32
    %c0_i32_0 = arith.constant 0 : i32
    %c0_i32_1 = arith.constant 0 : i32
    return %c0_i32, %c0_i32_0 : i32, i32
  }
  func.func @transform_2(%arg0: i32) -> (i32, i32) {
    %c0_i32 = arith.constant 0 : i32
    %c0_i32_0 = arith.constant 0 : i32
    %c0_i32_1 = arith.constant 0 : i32
    return %c0_i32, %c0_i32_0 : i32, i32
  }
  func.func @transform_3(%arg0: i32) -> (i32, i32) {
    %c0_i32 = arith.constant 0 : i32
    %c0_i32_0 = arith.constant 0 : i32
    %c0_i32_1 = arith.constant 0 : i32
    return %c0_i32, %c0_i32_0 : i32, i32
  }
  func.func @transform_4(%arg0: i32) -> (i32, i32) {
    %c0_i32 = arith.constant 0 : i32
    %c0_i32_0 = arith.constant 0 : i32
    %c0_i32_1 = arith.constant 0 : i32
    return %c0_i32, %c0_i32_0 : i32, i32
  }
  func.func @transform_5(%arg0: i32) -> (i32, i32) {
    %c0_i32 = arith.constant 0 : i32
    %c0_i32_0 = arith.constant 0 : i32
    %c0_i32_1 = arith.constant 0 : i32
    return %c0_i32, %c0_i32_0 : i32, i32
  }
  func.func @transform_6(%arg0: i32) -> (i32, i32) {
    %c0_i32 = arith.constant 0 : i32
    %c0_i32_0 = arith.constant 0 : i32
    %c0_i32_1 = arith.constant 0 : i32
    return %c0_i32, %c0_i32_0 : i32, i32
  }
  func.func @transform_7(%arg0: i32) -> (i32, i32) {
    %c0_i32 = arith.constant 0 : i32
    %c0_i32_0 = arith.constant 0 : i32
    return %arg0, %c0_i32 : i32, i32
  }
  func.func @transform_8(%arg0: i32) -> (i32, i32) {
    %c0_i32 = arith.constant 0 : i32
    %c0_i32_0 = arith.constant 0 : i32
    return %arg0, %c0_i32 : i32, i32
  }
}

</mosaic_0001>

<bundles_post_ra>
// kernel: tpu_custom_call.1
= control target key start
LH: loop header
LB: loop body
LE: loop exit
PB: predicated region body
PF: predicated region fallthrough
CT: control target
= control target key end

     0   :  { %14 = vsyncpa [#allocation3], 0  ;;  %s905_s0 = inlined_call_operand.vmem [shape: f32[8,128], index: 0, kind: input, shape index: {}]   ;;  %s906_s1 = inlined_call_operand.vmem [shape: f32[128,128], index: 1, kind: input, shape index: {}]   ;;  %s907_s2 = inlined_call_operand.vmem [shape: f32[1,128], index: 2, kind: input, shape index: {}]   ;;  %s908_s3 = inlined_call_operand.hbm [shape: f32[128,256], index: 3, kind: input, shape index: {}]   ;;  %s909_s4 = inlined_call_operand.vmem [shape: f32[1,256], index: 4, kind: input, shape index: {}]   ;;  %s910_s5 = inlined_call_operand.vmem [shape: f32[128,8], index: 5, kind: input, shape index: {}]   ;;  %s911_s6 = inlined_call_operand.vmem [shape: f32[1,8], index: 6, kind: input, shape index: {}]   ;;  %s912_s7 = inlined_call_operand.hbm [shape: f32[8,128], index: 7, kind: output, shape index: {0}]   ;;  %s913_s8 = inlined_call_operand.hbm [shape: f32[8,8], index: 8, kind: output, shape index: {1}]  }
   0x1   :  { %15 = vsyncpa [#allocation4], 0 }
   0x2   :  { %16 = vsyncpa [#allocation7], 0  ;;  %s687_s27 = smov [#allocation2]   ;;  %s615_s9 = scalar_lea.hbm %s908_s3, 4096 }
   0x3   :  { %s28_s28 = sshll.u32 %s687_s27, 4  ;;  %p616_p0 = scmp.ne.s32.totalorder %s908_s3, %s615_s9  ;;  %s29_s28 = int_to_ptr.vmem [resolvable:$true] %s28_s28 }
   0x4   :  { %p619_p1 = scmp.lt.u32.totalorder %s615_s9, %s908_s3 }
   0x6   :  { %p621_p2 = pnand %p619_p1, %p616_p0 }
   0x8   :  { %624 = shalt.err (!%p621_p2)
}
   0x9   :  { %s625_s14 = scalar_lea.vmem %s29_s28, 4096  ;;  %p630_p4 = scmp.lt.s32.totalorder %s29_s28, %s29_s28 }
   0xa   :  { %p626_p3 = scmp.ne.s32.totalorder %s29_s28, %s625_s14  ;;  %p631_p5 = scmp.lt.s32.totalorder %s625_s14, %s625_s14 }
   0xc   :  { %p632_p6 = por %p631_p5, %p630_p4 }
   0xe   :  { %p633_p7 = pnand %p632_p6, %p626_p3 }
  0x10   :  { %636 = shalt.err (!%p633_p7)
}
  0x11   :  { %s688_s15 = smov 256   ;;  %s689_s16 = smov 16  }
  0x12   :  { %34 = dma.hbm_to_vmem [thread:$0]  %s908_s3, 4096, %s29_s28, [#allocation3], %s688_s15, %s688_s15, %s689_s16  }
  0x13   :  { %681 = dma.done.wait [#allocation3], 4096  }
  0x14   :  { %682 = vsyncadd [#allocation3], 4294963200  ;;  %v690_v0 = vmov 0.0|0.0   ;;  %vm691_vm0 = vmmov 0   ;;  %v692_v1 = vmov 0.0   ;;  %v45_v2 = vld [vmem:[%s906_s1] sm:$0xff] }
  0x15   :  { %523 = vmatprep.subr.bf16.mxu0 %v690_v0  ;;  %485 = vmatprep.mubr.msk.f32.mxu0 %vm691_vm0, %v692_v1  ;;  %v46_v3 = vld [vmem:[%s906_s1 + $0x8] sm:$0xff]  ;;  %v47_v4 = vld [vmem:[%s906_s1 + $0x10] sm:$0xff]  ;;  %v48_v6 = vld [vmem:[%s906_s1 + $0x18] sm:$0xff] }
  0x16   :  { %247 = vmatprep.mubr.f32.mxu1 %v692_v1  ;;  %v524_v5 = vpack.c.bf16 %v46_v3, %v45_v2  ;;  %v527_v7 = vpack.c.bf16 %v48_v6, %v47_v4  ;;  %v49_v8 = vld [vmem:[%s906_s1 + $0x20] sm:$0xff]  ;;  %v50_v9 = vld [vmem:[%s906_s1 + $0x28] sm:$0xff]  ;;  %v51_v11 = vld [vmem:[%s906_s1 + $0x30] sm:$0xff] }
  0x17   :  { %v140_v10 = vld [vmem:[#allocation2 + $0x8] sm:$0xff]  ;;  %v52_v12 = vld [vmem:[%s906_s1 + $0x38] sm:$0xff]  ;;  %v139_v14 = vld [vmem:[#allocation2] sm:$0xff]  ;;  %v530_v16 = vpack.c.bf16 %v50_v9, %v49_v8 }
  0x18   :  { %525 = vmatpush3.bf16.msra.mxu0 %v524_v5  ;;  %v142_v13 = vld [vmem:[#allocation2 + $0x18] sm:$0xff]  ;;  %v141_v15 = vld [vmem:[#allocation2 + $0x10] sm:$0xff]  ;;  %v144_v19 = vld [vmem:[#allocation2 + $0x28] sm:$0xff]  ;;  %v533_v27 = vpack.c.bf16 %v52_v12, %v51_v11 }
  0x19   :  { %526 = vmatprep.subr.bf16.mxu0 %v690_v0  ;;  %v547_v17 = vpack.c.bf16 %v142_v13, %v140_v10  ;;  %v549_v18 = vpack.c.bf16 %v141_v15, %v139_v14  ;;  %v146_v20 = vld [vmem:[#allocation2 + $0x38] sm:$0xff]  ;;  %v143_v21 = vld [vmem:[#allocation2 + $0x20] sm:$0xff]  ;;  %v145_v23 = vld [vmem:[#allocation2 + $0x30] sm:$0xff] }
  0x1a   :  { %v551_v22 = vpack.c.bf16 %v146_v20, %v144_v19  ;;  %v148_v24 = vld [vmem:[#allocation2 + $0x48] sm:$0xff]  ;;  %v150_v25 = vld [vmem:[#allocation2 + $0x58] sm:$0xff]  ;;  %v553_v26 = vpack.c.bf16 %v145_v23, %v143_v21  ;;  %v53_v28 = vld [vmem:[%s906_s1 + $0x40] sm:$0xff] }
  0x1b   :  { %548 = vmatprep.subr.bf16.mxu1 %v547_v17  ;;  %v555_v29 = vpack.c.bf16 %v150_v25, %v148_v24  ;;  %v147_v30 = vld [vmem:[#allocation2 + $0x40] sm:$0xff]  ;;  %v149_v31 = vld [vmem:[#allocation2 + $0x50] sm:$0xff]  ;;  %v54_v32 = vld [vmem:[%s906_s1 + $0x48] sm:$0xff] }
  0x1c   :  { %528 = vmatpush3.bf16.msra.mxu0 %v527_v7  ;;  %550 = vmatpush1.bf16.msra.mxu1 %v549_v18  ;;  %v152_v33 = vld [vmem:[#allocation2 + $0x68] sm:$0xff]  ;;  %v154_v34 = vld [vmem:[#allocation2 + $0x78] sm:$0xff]  ;;  %v557_v35 = vpack.c.bf16 %v149_v31, %v147_v30  ;;  %v536_v36 = vpack.c.bf16 %v54_v32, %v53_v28  ;;  %v55_v37 = vld [vmem:[%s906_s1 + $0x50] sm:$0xff] }
  0x1d   :  { %529 = vmatprep.subr.bf16.mxu0 %v690_v0  ;;  %552 = vmatprep.subr.bf16.mxu1 %v551_v22  ;;  %v559_v38 = vpack.c.bf16 %v154_v34, %v152_v33  ;;  %v151_v39 = vld [vmem:[#allocation2 + $0x60] sm:$0xff]  ;;  %v153_v40 = vld [vmem:[#allocation2 + $0x70] sm:$0xff]  ;;  %v56_v41 = vld [vmem:[%s906_s1 + $0x58] sm:$0xff] }
  0x1e   :  { %v156_v42 = vld [vmem:[#allocation2 + $0x88] sm:$0xff]  ;;  %v158_v43 = vld [vmem:[#allocation2 + $0x98] sm:$0xff]  ;;  %v561_v44 = vpack.c.bf16 %v153_v40, %v151_v39  ;;  %v539_v45 = vpack.c.bf16 %v56_v41, %v55_v37  ;;  %v57_v46 = vld [vmem:[%s906_s1 + $0x60] sm:$0xff] }
  0x1f   :  { %v563_v47 = vpack.c.bf16 %v158_v43, %v156_v42  ;;  %v155_v48 = vld [vmem:[#allocation2 + $0x80] sm:$0xff]  ;;  %v157_v49 = vld [vmem:[#allocation2 + $0x90] sm:$0xff]  ;;  %v58_v50 = vld [vmem:[%s906_s1 + $0x68] sm:$0xff] }
  0x20   :  { %531 = vmatpush3.bf16.msra.mxu0 %v530_v16  ;;  %554 = vmatpush1.bf16.msra.mxu1 %v553_v26  ;;  %v160_v51 = vld [vmem:[#allocation2 + $0xa8] sm:$0xff]  ;;  %v162_v52 = vld [vmem:[#allocation2 + $0xb8] sm:$0xff]  ;;  %v565_v53 = vpack.c.bf16 %v157_v49, %v155_v48  ;;  %v542_v54 = vpack.c.bf16 %v58_v50, %v57_v46  ;;  %v59_v55 = vld [vmem:[%s906_s1 + $0x70] sm:$0xff] }
  0x21   :  { %532 = vmatprep.subr.bf16.mxu0 %v690_v0  ;;  %556 = vmatprep.subr.bf16.mxu1 %v555_v29  ;;  %v567_v56 = vpack.c.bf16 %v162_v52, %v160_v51  ;;  %v159_v57 = vld [vmem:[#allocation2 + $0xa0] sm:$0xff]  ;;  %v161_v58 = vld [vmem:[#allocation2 + $0xb0] sm:$0xff]  ;;  %v60_v59 = vld [vmem:[%s906_s1 + $0x78] sm:$0xff] }
  0x22   :  { %v164_v60 = vld [vmem:[#allocation2 + $0xc8] sm:$0xff]  ;;  %v166_v61 = vld [vmem:[#allocation2 + $0xd8] sm:$0xff]  ;;  %v569_v62 = vpack.c.bf16 %v161_v58, %v159_v57  ;;  %v545_v63 = vpack.c.bf16 %v60_v59, %v59_v55  ;;  %v163_v3 = vld [vmem:[#allocation2 + $0xc0] sm:$0xff] }
  0x23   :  { %v571_v2 = vpack.c.bf16 %v166_v61, %v164_v60  ;;  %v165_v4 = vld [vmem:[#allocation2 + $0xd0] sm:$0xff]  ;;  %v44_v6 = vld [vmem:[%s905_s0] sm:$0xff]  ;;  %v168_v7 = vld [vmem:[#allocation2 + $0xe8] sm:$0xff] }
  0x24   :  { %534 = vmatpush3.bf16.msra.mxu0 %v533_v27  ;;  %558 = vmatpush1.bf16.msra.mxu1 %v557_v35  ;;  %v573_v5 = vpack.c.bf16 %v165_v4, %v163_v3  ;;  %v170_v8 = vld [vmem:[#allocation2 + $0xf8] sm:$0xff]  ;;  %v167_v10 = vld [vmem:[#allocation2 + $0xe0] sm:$0xff]  ;;  %v169_v11 = vld [vmem:[#allocation2 + $0xf0] sm:$0xff] }
  0x25   :  { %535 = vmatprep.subr.bf16.mxu0 %v690_v0  ;;  %560 = vmatprep.subr.bf16.mxu1 %v559_v38  ;;  %v575_v9 = vpack.c.bf16 %v170_v8, %v168_v7  ;;  %v577_v12 = vpack.c.bf16 %v169_v11, %v167_v10  ;;  %v256_v13 = vld [vmem:[%s910_s5] sm:$0xff]  ;;  %v257_v14 = vld [vmem:[%s910_s5 + $0x8] sm:$0xff]  ;;  %v259_v16 = vld [vmem:[%s910_s5 + $0x18] sm:$0xff] }
  0x26   :  { %v580_v15 = vpack.c.bf16 %v257_v14, %v256_v13  ;;  %v260_v18 = vld [vmem:[%s910_s5 + $0x20] sm:$0xff]  ;;  %v261_v19 = vld [vmem:[%s910_s5 + $0x28] sm:$0xff]  ;;  %v262_v21 = vld [vmem:[%s910_s5 + $0x30] sm:$0xff] }
  0x27   :  { %v586_v20 = vpack.c.bf16 %v261_v19, %v260_v18  ;;  %v263_v22 = vld [vmem:[%s910_s5 + $0x38] sm:$0xff]  ;;  %v264_v24 = vld [vmem:[%s910_s5 + $0x40] sm:$0xff]  ;;  %v265_v25 = vld [vmem:[%s910_s5 + $0x48] sm:$0xff] }
  0x28   :  { %537 = vmatpush3.bf16.msra.mxu0 %v536_v36  ;;  %562 = vmatpush1.bf16.msra.mxu1 %v561_v44  ;;  %v589_v23 = vpack.c.bf16 %v263_v22, %v262_v21  ;;  %v592_v26 = vpack.c.bf16 %v265_v25, %v264_v24  ;;  %v266_v27 = vld [vmem:[%s910_s5 + $0x50] sm:$0xff]  ;;  %v267_v28 = vld [vmem:[%s910_s5 + $0x58] sm:$0xff]  ;;  %v268_v30 = vld [vmem:[%s910_s5 + $0x60] sm:$0xff] }
  0x29   :  { %538 = vmatprep.subr.bf16.mxu0 %v690_v0  ;;  %564 = vmatprep.subr.bf16.mxu1 %v563_v47  ;;  %v595_v29 = vpack.c.bf16 %v267_v28, %v266_v27  ;;  %v269_v31 = vld [vmem:[%s910_s5 + $0x68] sm:$0xff]  ;;  %v417_v33 = vld [vmem:[%s907_s2] ss:$0 sm:$0xff]  ;;  %v270_v38 = vld [vmem:[%s910_s5 + $0x70] sm:$0xff] }
  0x2a   :  { %v598_v32 = vpack.c.bf16 %v269_v31, %v268_v30  ;;  %v271_v39 = vld [vmem:[%s910_s5 + $0x78] sm:$0xff]  ;;  %v171_v43 = vld [vmem:[%s909_s4] sm:$0x3] }
  0x2b   :  { %v601_v40 = vpack.c.bf16 %v271_v39, %v270_v38 }
  0x2c   :  { %540 = vmatpush3.bf16.msra.mxu0 %v539_v45  ;;  %566 = vmatpush1.bf16.msra.mxu1 %v565_v53 }
  0x2d   :  { %541 = vmatprep.subr.bf16.mxu0 %v690_v0  ;;  %568 = vmatprep.subr.bf16.mxu1 %v567_v56 }
  0x30   :  { %543 = vmatpush3.bf16.msra.mxu0 %v542_v54  ;;  %570 = vmatpush1.bf16.msra.mxu1 %v569_v62 }
  0x31   :  { %544 = vmatprep.subr.bf16.mxu0 %v690_v0  ;;  %572 = vmatprep.subr.bf16.mxu1 %v571_v2 }
  0x34   :  { %546 = vmatpush3.bf16.msra.mxu0 %v545_v63  ;;  %574 = vmatpush1.bf16.msra.mxu1 %v573_v5 }
  0x35   :  { %579 = vmatprep.subr.bf16.mxu0 %v690_v0  ;;  %576 = vmatprep.subr.bf16.mxu1 %v575_v9 }
  0x37   :  { %486 = vmatmul.mubr.f32.vlgmr.msra.gmra.mrb[0].mxu0 %v44_v6 }
  0x38   :  { %520 = vmatprep.mubr.msk.f32.mxu0 %vm691_vm0, %v692_v1  ;;  %578 = vmatpush1.bf16.msra.mxu1 %v577_v12  ;;  %v258_v1 = vld [vmem:[%s910_s5 + $0x10] sm:$0xff]  ;;  %s693_s5 = smov [#allocation5]  }
  0x39   :  { %581 = vmatpush3.bf16.msra.mxu0 %v580_v15  ;;  %v583_v17 = vpack.c.bf16 %v259_v16, %v258_v1  ;;  %s394_s15 = sshll.u32 %s693_s5, 4  ;;  %s395_s15 = int_to_ptr.vmem [resolvable:$true] %s394_s15 }
  0x3a   :  { %582 = vmatprep.subr.bf16.mxu0 %v690_v0  ;;  %s637_s16 = scalar_lea.vmem %s395_s15, 128  ;;  %p642_p9 = scmp.lt.s32.totalorder %s395_s15, %s395_s15 }
  0x3b   :  { %p638_p8 = scmp.ne.s32.totalorder %s395_s15, %s637_s16  ;;  %p643_p10 = scmp.lt.s32.totalorder %s637_s16, %s637_s16 }
  0x3d   :  { %584 = vmatpush3.bf16.msra.mxu0 %v583_v17  ;;  %p644_p11 = por %p643_p10, %p642_p9 }
  0x3e   :  { %585 = vmatprep.subr.bf16.mxu0 %v690_v0 }
  0x3f   :  { %p645_p12 = pnand %p644_p11, %p638_p8 }
  0x41   :  { %587 = vmatpush3.bf16.msra.mxu0 %v586_v20 }
  0x42   :  { %588 = vmatprep.subr.bf16.mxu0 %v690_v0 }
  0x45   :  { %590 = vmatpush3.bf16.msra.mxu0 %v589_v23 }
  0x46   :  { %591 = vmatprep.subr.bf16.mxu0 %v690_v0 }
  0x49   :  { %593 = vmatpush3.bf16.msra.mxu0 %v592_v26 }
  0x4a   :  { %594 = vmatprep.subr.bf16.mxu0 %v690_v0 }
  0x4d   :  { %596 = vmatpush3.bf16.msra.mxu0 %v595_v29 }
  0x4e   :  { %597 = vmatprep.subr.bf16.mxu0 %v690_v0 }
  0x51   :  { %599 = vmatpush3.bf16.msra.mxu0 %v598_v32 }
  0x52   :  { %600 = vmatprep.subr.bf16.mxu0 %v690_v0  ;;  %v173_v0 = vlaneseq }
  0x54   :  { %v174_v41 = vshrl.u32 %v173_v0, 7 }
  0x55   :  { %602 = vmatpush3.bf16.msra.mxu0 %v601_v40 }
  0x56   :  { %v175_v42 = vsub.s32 0, %v174_v41  ;;  %v179_v44 = vsub.s32 1, %v174_v41 }
  0x58   :  { %v176_v45 = vrot.slane %v171_v43, %v175_v42  ;;  %v180_v46 = vrot.slane %v171_v43, %v179_v44 }
 0x10a   :  { %v134_v34 = vpop.f32.mrb[0].mxu0 }
 0x10b   :  { %v135_v35 = vadd.f32 %v417_v33, %v134_v34  ;;  %v487_v36 = vpop.f32.mrb[1].mxu0 }
 0x10d   :  { %v138_v37 = vmax.f32 %v135_v35, 0.0 }
 0x10f   :  { %248 = vmatmul.mubr.f32.vlgmr.msra.gmra.mrb[0].mxu1 %v138_v37 }
 0x1e2   :  { %v249_v47 = vpop.f32.mrb[0].mxu1 }
 0x1e3   :  { %v250_v48 = vadd.f32 %v249_v47, %v176_v45  ;;  %v251_v49 = vpop.f32.mrb[1].mxu1 }
 0x1e4   :  { %v252_v50 = vadd.f32 %v251_v49, %v180_v46 }
 0x1e5   :  { %v254_v51 = vmax.f32 %v250_v48, 0.0 }
 0x1e6   :  { %v255_v52 = vmax.f32 %v252_v50, 0.0 }
 0x1e7   :  { %521 = vmatmul.mubr.f32.vlgmr.msra.gmra.mrb[2].mxu0 %v254_v51 }
 0x1e8   :  { %387 = vst [vmem:[#allocation5] sm:$0xff] %v255_v52 }
 0x1e9   :  { %648 = shalt.err (!%p645_p12)
}
 0x1ea   :  { %s649_s18 = scalar_lea.hbm %s912_s7, 128 }
 0x1eb   :  { %p650_p13 = scmp.ne.s32.totalorder %s912_s7, %s649_s18  ;;  %p653_p0 = scmp.lt.u32.totalorder %s649_s18, %s912_s7 }
 0x1ed   :  { %p655_p1 = pnand %p653_p0, %p650_p13 }
 0x1ef   :  { %658 = shalt.err (!%p655_p1)
}
 0x1f0   :  { %397 = dma.vmem_to_hbm [thread:$0]  %s395_s15, 128, %s912_s7, [#allocation4]   ;;  %v418_v53 = vld [vmem:[%s911_s6] ss:$0 sm:$0xff]  ;;  %v370_v2 = vand.u32 127, %v173_v0  ;;  %vm385_vm5 = vcmask 64512  }
 0x1f1   :  { %s694_s6 = smov [#allocation6]  }
 0x1f2   :  { %v375_v7 = vand.u32 1, %v370_v2  ;;  %s404_s7 = sshll.u32 %s694_s6, 4  ;;  %s405_s7 = int_to_ptr.vmem [resolvable:$true] %s404_s7 }
 0x1f3   :  { %s659_s26 = scalar_lea.vmem %s405_s7, 128  ;;  %p664_p3 = scmp.lt.s32.totalorder %s405_s7, %s405_s7 }
 0x1f4   :  { %vm383_vm3 = vcmp.eq.s32.totalorder %v375_v7, 1  ;;  %p660_p2 = scmp.ne.s32.totalorder %s405_s7, %s659_s26  ;;  %p665_p4 = scmp.lt.s32.totalorder %s659_s26, %s659_s26 }
 0x1f6   :  { %p666_p5 = por %p665_p4, %p664_p3 }
 0x1f8   :  { %p667_p6 = pnand %p666_p5, %p660_p2 }
 0x2ba   :  { %v345_v54 = vpop.f32.mrb[2].mxu0 }
 0x2bb   :  { %v346_v55 = vadd.f32 %v418_v53, %v345_v54  ;;  %v522_v56 = vpop.f32.mrb[3].mxu0 }
 0x2bd   :  { %v353_v57 = vand.u32 2147483647, %v346_v55  ;;  %v350_v8 = vmax.f32 %v346_v55, 0.0  ;;  %vm351_vm2 = vcmp.ne.f32.partialorder %v346_v55, %v346_v55  ;;  %vm349_vm4 = vcmp.gt.f32.partialorder %v346_v55, 20.0 }
 0x2bf   :  { %v354_v58 = vsub.f32 0.0, %v353_v57 }
 0x2c1   :  { %v355_v59 = vmul.f32 1.442695, %v354_v58 }
 0x2c3   :  { %611 = vpow2.f32 %v355_v59 }
 0x2cd   :  { %v612_v60 = vpop.eup %611 }
 0x2ce   :  { %v357_v61 = vadd.f32 1.0, %v612_v60  ;;  %v360_v62 = vmul.f32 -0.5, %v612_v60  ;;  %v363_v3 = vand.u32 2147483647, %v612_v60 }
 0x2d0   :  { %613 = vlog2.f32 %v357_v61  ;;  %v361_v63 = vadd.f32 1.0, %v360_v62  ;;  %vm364_vm1 = vcmp.lt.f32.partialorder %v363_v3, 0.0004427343 }
 0x2d2   :  { %v362_v6 = vmul.f32 %v612_v60, %v361_v63 }
 0x2da   :  { %v614_v4 = vpop.eup %613 }
 0x2db   :  { %v359_v5 = vmul.f32 0.6931472, %v614_v4 }
 0x2dd   :  { %v365_v9 = vsel %vm364_vm1, %v362_v6, %v359_v5 }
 0x2de   :  { %v366_v10 = vadd.f32 %v365_v9, %v350_v8 }
 0x2e0   :  { %v367_v11 = vsel %vm351_vm2, %v346_v55, %v366_v10 }
 0x2e1   :  { %v368_v12 = vsel %vm349_vm4, %v346_v55, %v367_v11 }
 0x2e2   :  { %v384_v13 = vsel %vm383_vm3, %v368_v12, %v346_v55 }
 0x2e3   :  { %386 = vst.msk [vmem:[#allocation6] sm:$0xff] %vm385_vm5, %v384_v13 }
 0x2e4   :  { %670 = shalt.err (!%p667_p6)
}
 0x2e5   :  { %s671_s1 = scalar_lea.hbm %s913_s8, 128 }
 0x2e6   :  { %p672_p7 = scmp.ne.s32.totalorder %s913_s8, %s671_s1  ;;  %p675_p8 = scmp.lt.u32.totalorder %s671_s1, %s913_s8 }
 0x2e8   :  { %p677_p9 = pnand %p675_p8, %p672_p7 }
 0x2ea   :  { %680 = shalt.err (!%p677_p9)
}
 0x2eb   :  { %407 = dma.vmem_to_hbm [thread:$0]  %s405_s7, 128, %s913_s8, [#allocation7]  }
 0x2ec   :  { %683 = dma.done.wait [#allocation4], 128  }
 0x2ed   :  { %684 = vsyncadd [#allocation4], 4294967168 }
 0x2ee   :  { %685 = dma.done.wait [#allocation7], 128  }
 0x2ef   :  { %686 = vsyncadd [#allocation7], 4294967168 }
 0x2f0   :  { %414 = vsyncpa [#allocation3], 1 }
 0x2f1   :  { %415 = vsyncpa [#allocation4], 1 }
 0x2f2   :  { %416 = vsyncpa [#allocation7], 1 }

</bundles_post_ra>
